<compile_context>
chip_gen: v6e
topology: v6e:2x2x1
jax: 0.10.0
libtpu: 0.0.40
codegen_flags: <defaults>
</compile_context>

<pallas_src>
import functools

import jax
import jax.numpy as jnp
import numpy as np
from jax.experimental import pallas as pl
from jax.experimental.pallas import tpu as pltpu

HIDDEN = 32        # rep dimension produced by model.feature_extractor
NUM_CLASSES = 10
N_PAD = 128        # lane-dense padded head output width (sliced back outside)
LN_EPS = 1e-5


def _ensemble_kernel(flag, has_context, *refs):
    """Fused forward for one (TB, D_in) batch tile. flag/has_context are static."""
    it = iter(refs)
    x_ref = next(it)
    ctx_ref = next(it) if has_context else None
    wfe_ref, bfe_ref = next(it), next(it)
    wcs_a_ref, bcs_a_ref, g_a_ref, b_a_ref = next(it), next(it), next(it), next(it)
    wcs_b_ref, bcs_b_ref, g_b_ref, b_b_ref = next(it), next(it), next(it), next(it)
    if flag == 0:
        wA_ref, wB_ref, bias_ref = next(it), next(it), next(it)
    else:
        wA_ref, bias_ref = next(it), next(it)
        wB_ref = None
    itau_ref = next(it)
    out_ref = next(it)

    x = x_ref[...]                                                  # [TB, D_in]

    # --- model.feature_extractor: Linear + ReLU (native-dtype x, f32 accum) ---
    rep = jnp.dot(x, wfe_ref[...], preferred_element_type=jnp.float32) + bfe_ref[...]
    rep = jnp.maximum(rep, 0.0)                                     # [TB, H]

    # --- gate_in = rep * normalized context (skipped entirely when None) -----
    gate_in = rep * ctx_ref[...] if has_context else rep

    # --- cs: Linear(H -> 2H) split into two N=H halves; LayerNorm over 2H ----
    ha = jnp.dot(gate_in, wcs_a_ref[...], preferred_element_type=jnp.float32) + bcs_a_ref[...]
    hb = jnp.dot(gate_in, wcs_b_ref[...], preferred_element_type=jnp.float32) + bcs_b_ref[...]
    two_h = float(2 * ha.shape[-1])
    mu = (jnp.sum(ha, -1, keepdims=True) + jnp.sum(hb, -1, keepdims=True)) / two_h
    da = ha - mu
    db = hb - mu
    var = (jnp.sum(da * da, -1, keepdims=True)
           + jnp.sum(db * db, -1, keepdims=True)) / two_h
    inv_std = jax.lax.rsqrt(var + LN_EPS)
    a = jnp.maximum(da * inv_std * g_a_ref[...] + b_a_ref[...], 0.0)
    b = jnp.maximum(db * inv_std * g_b_ref[...] + b_b_ref[...], 0.0)

    # --- 2-way temperature softmax over (a, b) == sigmoid of scaled diff -----
    # TODO(synk): F.gumbel_softmax adds Gumbel noise during training; this is
    # the deterministic zero-noise, hard=False evaluation path.
    pm = jax.nn.sigmoid((a - b) * itau_ref[0])                      # gm = 1 - pm

    # --- Gate + head(s), lane-padded to N_PAD ---------------------------------
    if flag == 0:
        # head(rep*pm) + head_g(rep*(1-pm)) == rep@wg + (rep*pm)@(wh-wg) + (bh+bg)
        out = (jnp.dot(rep, wA_ref[...], preferred_element_type=jnp.float32)
               + jnp.dot(rep * pm, wB_ref[...], preferred_element_type=jnp.float32)
               + bias_ref[...])
    elif flag == 1:
        out = jnp.dot(rep * pm, wA_ref[...],
                      preferred_element_type=jnp.float32) + bias_ref[...]
    else:
        out = jnp.dot(rep * (1.0 - pm), wA_ref[...],
                      preferred_element_type=jnp.float32) + bias_ref[...]

    out_ref[...] = out.astype(out_ref.dtype)


def ensemble_forward(x, params, context=None, tau=1.0, flag=0):
    """JAX wrapper: flatten NCHW input, tile the batch, call the fused kernel."""
    flag = int(flag)
    has_context = context is not None
    f32 = jnp.float32

    B = x.shape[0]
    x_flat = x.reshape(B, -1)                       # keep native dtype (bf16 OK)
    D_in = x_flat.shape[1]
    x_bytes = jnp.dtype(x_flat.dtype).itemsize

    # Batch tile: big enough to approach the HBM roofline, small enough that
    # two pipeline buffers of x stay well inside v7x's 64 MiB VMEM.
    TB = 512
    while TB > 8 and 2 * TB * D_in * x_bytes > (16 << 20):
        TB //= 2
    if B <= TB:
        TB = max(8, ((B + 7) // 8) * 8)
    B_pad = pl.cdiv(B, TB) * TB
    if B_pad != B:
        x_flat = jnp.pad(x_flat, ((0, B_pad - B), (0, 0)))

    # Feature-extractor weights match x's dtype (native bf16 MXU path), f32 accum.
    wfe = params["wfe"].astype(x_flat.dtype)
    bfe = params["bfe"].astype(f32)

    # Split ConditionalSelection Linear/LayerNorm params into the two H halves.
    wcs = params["wcs"].astype(f32)
    bcs = params["bcs"].astype(f32)
    gln = params["gln"].astype(f32)
    bln = params["bln"].astype(f32)
    H = wcs.shape[0]
    wcs_a, wcs_b = wcs[:, :H], wcs[:, H:]
    bcs_a, bcs_b = bcs[:, :H], bcs[:, H:]
    gln_a, gln_b = gln[:, :H], gln[:, H:]
    bln_a, bln_b = bln[:, :H], bln[:, H:]

    # Lane-dense (128-wide) padded heads; flag==0 heads are algebraically fused.
    def pad_n(w):
        w = w.astype(f32)
        return jnp.pad(w, ((0, 0), (0, N_PAD - w.shape[-1])))
    wh, bh = pad_n(params["wh"]), pad_n(params["bh"])
    wg, bg = pad_n(params["wg"]), pad_n(params["bg"])
    if flag == 0:
        head_arrays = (wg, wh - wg, bh + bg)
    elif flag == 1:
        head_arrays = (wh, bh)
    else:
        head_arrays = (wg, bg)

    inv_tau = jnp.asarray([1.0 / float(tau)], f32)

    def const_vspec(shape):
        return pl.BlockSpec(shape, lambda i, _n=len(shape): (0,) * _n,
                            memory_space=pltpu.MemorySpace.VMEM)

    operands = [x_flat]
    in_specs = [pl.BlockSpec((TB, D_in), lambda i: (i, 0),
                             memory_space=pltpu.MemorySpace.VMEM)]
    if has_context:
        ctx = context.astype(f32)
        nrm = jnp.sqrt(jnp.sum(ctx * ctx, axis=1, keepdims=True))
        ctx = ctx / jnp.maximum(nrm, 1e-12)        # F.normalize(p=2, dim=1) w/ eps
        operands.append(ctx)
        in_specs.append(const_vspec(ctx.shape))
    for arr in (wfe, bfe, wcs_a, bcs_a, gln_a, bln_a,
                wcs_b, bcs_b, gln_b, bln_b, *head_arrays):
        operands.append(arr)
        in_specs.append(const_vspec(arr.shape))
    operands.append(inv_tau)
    in_specs.append(pl.BlockSpec((1,), lambda i: (0,),
                                 memory_space=pltpu.MemorySpace.SMEM))

    # Advisory cost hint so XLA overlaps this memory-bound call with neighbors.
    head_k = 2 if flag == 0 else 1
    flops = 2 * B_pad * (D_in * H + 2 * H * H + head_k * H * N_PAD)
    bytes_accessed = (B_pad * D_in * x_bytes + B_pad * N_PAD * 4
                      + sum(int(np.prod(a.shape)) * jnp.dtype(a.dtype).itemsize
                            for a in operands[1:]))
    cost = pl.CostEstimate(flops=int(flops),
                           transcendentals=int(B_pad * H),
                           bytes_accessed=int(bytes_accessed))

    kernel = functools.partial(_ensemble_kernel, flag, has_context)
    out = pl.pallas_call(
        kernel,
        grid=(B_pad // TB,),
        in_specs=in_specs,
        out_specs=pl.BlockSpec((TB, N_PAD), lambda i: (i, 0),
                               memory_space=pltpu.MemorySpace.VMEM),
        out_shape=jax.ShapeDtypeStruct((B_pad, N_PAD), f32),
        compiler_params=pltpu.CompilerParams(
            dimension_semantics=("parallel",),
            vmem_limit_bytes=32 * 1024 * 1024),
        cost_estimate=cost,
    )(*operands)
    return out[:B, :NUM_CLASSES]
    # TODO(synk): is_rep=True path (returning rep and the frozen global
    # feature_extractor(x)) and the Gate's python-side pm/gm list bookkeeping
    # are not part of the numeric hot path and are not implemented here.


def reference_forward(x, params, context=None, tau=1.0, flag=0):
    """Pure-JAX reference of the same forward."""
    B = x.shape[0]
    xf = x.reshape(B, -1).astype(jnp.float32)
    rep = jax.nn.relu(xf @ params["wfe"].astype(jnp.float32) + params["bfe"])
    if context is None:
        gate_in = rep
    else:
        ctx = context.astype(jnp.float32)
        ctx = ctx / jnp.maximum(jnp.linalg.norm(ctx, axis=1, keepdims=True), 1e-12)
        gate_in = rep * ctx
    h = gate_in @ params["wcs"] + params["bcs"]
    mu = h.mean(-1, keepdims=True)
    var = ((h - mu) ** 2).mean(-1, keepdims=True)
    h = (h - mu) / jnp.sqrt(var + LN_EPS) * params["gln"] + params["bln"]
    h = jax.nn.relu(h)
    logits = h.reshape(B, 2, HIDDEN)
    probs = jax.nn.softmax(logits / tau, axis=1)
    pm, gm = probs[:, 0, :], probs[:, 1, :]
    if flag == 0:
        return ((rep * pm) @ params["wh"] + params["bh"]
                + (rep * gm) @ params["wg"] + params["bg"])
    elif flag == 1:
        return (rep * pm) @ params["wh"] + params["bh"]
    else:
        return (rep * gm) @ params["wg"] + params["bg"]


if __name__ == "__main__":
    key = jax.random.PRNGKey(0)
    B, C, Hh, Ww = 2, 4, 16, 16
    D_in = C * Hh * Ww

    keys = jax.random.split(key, 12)
    params = {
        "wfe": jax.random.normal(keys[0], (D_in, HIDDEN), jnp.float32) * 0.02,
        "bfe": jax.random.normal(keys[1], (1, HIDDEN), jnp.float32) * 0.02,
        "wcs": jax.random.normal(keys[2], (HIDDEN, 2 * HIDDEN), jnp.float32) * 0.1,
        "bcs": jax.random.normal(keys[3], (1, 2 * HIDDEN), jnp.float32) * 0.1,
        "gln": jnp.ones((1, 2 * HIDDEN), jnp.float32),    # LayerNorm gamma (PyTorch default)
        "bln": jnp.zeros((1, 2 * HIDDEN), jnp.float32),   # LayerNorm beta
        "wh": jax.random.normal(keys[4], (HIDDEN, NUM_CLASSES), jnp.float32) * 0.1,
        "bh": jax.random.normal(keys[5], (1, NUM_CLASSES), jnp.float32) * 0.1,
        "wg": jax.random.normal(keys[6], (HIDDEN, NUM_CLASSES), jnp.float32) * 0.1,
        "bg": jax.random.normal(keys[7], (1, NUM_CLASSES), jnp.float32) * 0.1,
    }
    x = jax.random.normal(keys[8], (B, C, Hh, Ww), jnp.float32)
    ctx_vec = jax.random.normal(keys[9], (1, HIDDEN), jnp.float32)

    # flag == 0, no context (module default path)
    out = jax.block_until_ready(ensemble_forward(x, params, context=None, tau=1.0, flag=0))
    ref = reference_forward(x, params, context=None, tau=1.0, flag=0)
    assert out.shape == (B, NUM_CLASSES)
    np.testing.assert_allclose(np.asarray(out), np.asarray(ref), rtol=1e-5, atol=1e-5)

    # flag == 0 with a provided context vector
    out_c = jax.block_until_ready(ensemble_forward(x, params, context=ctx_vec, tau=0.5, flag=0))
    ref_c = reference_forward(x, params, context=ctx_vec, tau=0.5, flag=0)
    np.testing.assert_allclose(np.asarray(out_c), np.asarray(ref_c), rtol=1e-5, atol=1e-5)

    # flag == 1 (personalized head only) and flag == 2 (global head only)
    for fl in (1, 2):
        o = jax.block_until_ready(ensemble_forward(x, params, context=None, tau=1.0, flag=fl))
        r = reference_forward(x, params, context=None, tau=1.0, flag=fl)
        np.testing.assert_allclose(np.asarray(o), np.asarray(r), rtol=1e-5, atol=1e-5)

    print("KERNEL_OK")
</pallas_src>

<mosaic_0001>
module attributes {stable_mosaic.version = 11 : i64} {
  func.func @_ensemble_kernel(%arg0: i32, %arg1: memref<8x1024xf32, #tpu.memory_space<vmem>>, %arg2: memref<1024x32xf32, #tpu.memory_space<vmem>>, %arg3: memref<1x32xf32, #tpu.memory_space<vmem>>, %arg4: memref<32x32xf32, #tpu.memory_space<vmem>>, %arg5: memref<1x32xf32, #tpu.memory_space<vmem>>, %arg6: memref<1x32xf32, #tpu.memory_space<vmem>>, %arg7: memref<1x32xf32, #tpu.memory_space<vmem>>, %arg8: memref<32x32xf32, #tpu.memory_space<vmem>>, %arg9: memref<1x32xf32, #tpu.memory_space<vmem>>, %arg10: memref<1x32xf32, #tpu.memory_space<vmem>>, %arg11: memref<1x32xf32, #tpu.memory_space<vmem>>, %arg12: memref<32x128xf32, #tpu.memory_space<vmem>>, %arg13: memref<32x128xf32, #tpu.memory_space<vmem>>, %arg14: memref<1x128xf32, #tpu.memory_space<vmem>>, %arg15: memref<1xf32, #tpu.memory_space<smem>>, %arg16: memref<8x128xf32, #tpu.memory_space<vmem>>) attributes {dimension_semantics = [#tpu.dimension_semantics<parallel>], iteration_bounds = array<i64: 1>, scalar_prefetch = 0 : i64, scratch_operands = 0 : i64, tpu.core_type = #tpu.core_type<tc>, window_params = [{transform_indices = @transform_0, window_bounds = array<i64: 8, 1024>}, {pipeline_mode = #tpu.pipeline_mode<synchronous>, transform_indices = @transform_1, window_bounds = array<i64: 1024, 32>}, {pipeline_mode = #tpu.pipeline_mode<synchronous>, transform_indices = @transform_2, window_bounds = array<i64: 1, 32>}, {pipeline_mode = #tpu.pipeline_mode<synchronous>, transform_indices = @transform_3, window_bounds = array<i64: 32, 32>}, {pipeline_mode = #tpu.pipeline_mode<synchronous>, transform_indices = @transform_4, window_bounds = array<i64: 1, 32>}, {pipeline_mode = #tpu.pipeline_mode<synchronous>, transform_indices = @transform_5, window_bounds = array<i64: 1, 32>}, {pipeline_mode = #tpu.pipeline_mode<synchronous>, transform_indices = @transform_6, window_bounds = array<i64: 1, 32>}, {pipeline_mode = #tpu.pipeline_mode<synchronous>, transform_indices = @transform_7, window_bounds = array<i64: 32, 32>}, {pipeline_mode = #tpu.pipeline_mode<synchronous>, transform_indices = @transform_8, window_bounds = array<i64: 1, 32>}, {pipeline_mode = #tpu.pipeline_mode<synchronous>, transform_indices = @transform_9, window_bounds = array<i64: 1, 32>}, {pipeline_mode = #tpu.pipeline_mode<synchronous>, transform_indices = @transform_10, window_bounds = array<i64: 1, 32>}, {pipeline_mode = #tpu.pipeline_mode<synchronous>, transform_indices = @transform_11, window_bounds = array<i64: 32, 128>}, {pipeline_mode = #tpu.pipeline_mode<synchronous>, transform_indices = @transform_12, window_bounds = array<i64: 32, 128>}, {pipeline_mode = #tpu.pipeline_mode<synchronous>, transform_indices = @transform_13, window_bounds = array<i64: 1, 128>}, {transform_indices = @transform_14, window_bounds = array<i64: 1>}, {transform_indices = @transform_15, window_bounds = array<i64: 8, 128>}]} {
    %c0 = arith.constant 0 : index
    %c0_0 = arith.constant 0 : index
    %0 = vector.load %arg1[%c0, %c0_0] : memref<8x1024xf32, #tpu.memory_space<vmem>>, vector<8x1024xf32>
    %c0_1 = arith.constant 0 : index
    %c0_2 = arith.constant 0 : index
    %1 = vector.load %arg2[%c0_1, %c0_2] : memref<1024x32xf32, #tpu.memory_space<vmem>>, vector<1024x32xf32>
    %cst = arith.constant dense<0.000000e+00> : vector<8x32xf32>
    %2 = tpu.matmul %0, %1, %cst {dimension_numbers = #tpu.dot_dimension_numbers<[1], [0], [0], [1], [0, 0, 1, 1], [], []>} : vector<8x1024xf32>, vector<1024x32xf32>, vector<8x32xf32> -> vector<8x32xf32>
    %c0_3 = arith.constant 0 : index
    %c0_4 = arith.constant 0 : index
    %3 = vector.load %arg3[%c0_3, %c0_4] : memref<1x32xf32, #tpu.memory_space<vmem>>, vector<1x32xf32>
    %4 = vector.broadcast %3 : vector<1x32xf32> to vector<8x32xf32>
    %5 = arith.addf %2, %4 : vector<8x32xf32>
    %cst_5 = arith.constant 0.000000e+00 : f32
    %6 = vector.broadcast %cst_5 : f32 to vector<8x32xf32>
    %7 = arith.maximumf %5, %6 : vector<8x32xf32>
    %c0_6 = arith.constant 0 : index
    %c0_7 = arith.constant 0 : index
    %8 = vector.load %arg4[%c0_6, %c0_7] : memref<32x32xf32, #tpu.memory_space<vmem>>, vector<32x32xf32>
    %cst_8 = arith.constant dense<0.000000e+00> : vector<8x32xf32>
    %9 = tpu.matmul %7, %8, %cst_8 {dimension_numbers = #tpu.dot_dimension_numbers<[1], [0], [0], [1], [0, 0, 1, 1], [], []>} : vector<8x32xf32>, vector<32x32xf32>, vector<8x32xf32> -> vector<8x32xf32>
    %c0_9 = arith.constant 0 : index
    %c0_10 = arith.constant 0 : index
    %10 = vector.load %arg5[%c0_9, %c0_10] : memref<1x32xf32, #tpu.memory_space<vmem>>, vector<1x32xf32>
    %11 = vector.broadcast %10 : vector<1x32xf32> to vector<8x32xf32>
    %12 = arith.addf %9, %11 : vector<8x32xf32>
    %c0_11 = arith.constant 0 : index
    %c0_12 = arith.constant 0 : index
    %13 = vector.load %arg8[%c0_11, %c0_12] : memref<32x32xf32, #tpu.memory_space<vmem>>, vector<32x32xf32>
    %cst_13 = arith.constant dense<0.000000e+00> : vector<8x32xf32>
    %14 = tpu.matmul %7, %13, %cst_13 {dimension_numbers = #tpu.dot_dimension_numbers<[1], [0], [0], [1], [0, 0, 1, 1], [], []>} : vector<8x32xf32>, vector<32x32xf32>, vector<8x32xf32> -> vector<8x32xf32>
    %c0_14 = arith.constant 0 : index
    %c0_15 = arith.constant 0 : index
    %15 = vector.load %arg9[%c0_14, %c0_15] : memref<1x32xf32, #tpu.memory_space<vmem>>, vector<1x32xf32>
    %16 = vector.broadcast %15 : vector<1x32xf32> to vector<8x32xf32>
    %17 = arith.addf %14, %16 : vector<8x32xf32>
    %cst_16 = arith.constant dense<0.000000e+00> : vector<8xf32>
    %18 = vector.multi_reduction <add>, %12, %cst_16 [1] : vector<8x32xf32> to vector<8xf32>
    %19 = vector.shape_cast %18 : vector<8xf32> to vector<8x1xf32>
    %cst_17 = arith.constant dense<0.000000e+00> : vector<8xf32>
    %20 = vector.multi_reduction <add>, %17, %cst_17 [1] : vector<8x32xf32> to vector<8xf32>
    %21 = vector.shape_cast %20 : vector<8xf32> to vector<8x1xf32>
    %22 = arith.addf %19, %21 : vector<8x1xf32>
    %cst_18 = arith.constant 6.400000e+01 : f32
    %23 = vector.broadcast %cst_18 : f32 to vector<8x1xf32>
    %24 = arith.divf %22, %23 : vector<8x1xf32>
    %25 = vector.broadcast %24 : vector<8x1xf32> to vector<8x32xf32>
    %26 = arith.subf %12, %25 : vector<8x32xf32>
    %27 = vector.broadcast %24 : vector<8x1xf32> to vector<8x32xf32>
    %28 = arith.subf %17, %27 : vector<8x32xf32>
    %29 = arith.mulf %26, %26 : vector<8x32xf32>
    %cst_19 = arith.constant dense<0.000000e+00> : vector<8xf32>
    %30 = vector.multi_reduction <add>, %29, %cst_19 [1] : vector<8x32xf32> to vector<8xf32>
    %31 = vector.shape_cast %30 : vector<8xf32> to vector<8x1xf32>
    %32 = arith.mulf %28, %28 : vector<8x32xf32>
    %cst_20 = arith.constant dense<0.000000e+00> : vector<8xf32>
    %33 = vector.multi_reduction <add>, %32, %cst_20 [1] : vector<8x32xf32> to vector<8xf32>
    %34 = vector.shape_cast %33 : vector<8xf32> to vector<8x1xf32>
    %35 = arith.addf %31, %34 : vector<8x1xf32>
    %cst_21 = arith.constant 6.400000e+01 : f32
    %36 = vector.broadcast %cst_21 : f32 to vector<8x1xf32>
    %37 = arith.divf %35, %36 : vector<8x1xf32>
    %cst_22 = arith.constant 9.99999974E-6 : f32
    %38 = vector.broadcast %cst_22 : f32 to vector<8x1xf32>
    %39 = arith.addf %37, %38 : vector<8x1xf32>
    %40 = math.rsqrt %39 : vector<8x1xf32>
    %41 = vector.broadcast %40 : vector<8x1xf32> to vector<8x32xf32>
    %42 = arith.mulf %26, %41 : vector<8x32xf32>
    %c0_23 = arith.constant 0 : index
    %c0_24 = arith.constant 0 : index
    %43 = vector.load %arg6[%c0_23, %c0_24] : memref<1x32xf32, #tpu.memory_space<vmem>>, vector<1x32xf32>
    %44 = vector.broadcast %43 : vector<1x32xf32> to vector<8x32xf32>
    %45 = arith.mulf %42, %44 : vector<8x32xf32>
    %c0_25 = arith.constant 0 : index
    %c0_26 = arith.constant 0 : index
    %46 = vector.load %arg7[%c0_25, %c0_26] : memref<1x32xf32, #tpu.memory_space<vmem>>, vector<1x32xf32>
    %47 = vector.broadcast %46 : vector<1x32xf32> to vector<8x32xf32>
    %48 = arith.addf %45, %47 : vector<8x32xf32>
    %cst_27 = arith.constant 0.000000e+00 : f32
    %49 = vector.broadcast %cst_27 : f32 to vector<8x32xf32>
    %50 = arith.maximumf %48, %49 : vector<8x32xf32>
    %51 = vector.broadcast %40 : vector<8x1xf32> to vector<8x32xf32>
    %52 = arith.mulf %28, %51 : vector<8x32xf32>
    %c0_28 = arith.constant 0 : index
    %c0_29 = arith.constant 0 : index
    %53 = vector.load %arg10[%c0_28, %c0_29] : memref<1x32xf32, #tpu.memory_space<vmem>>, vector<1x32xf32>
    %54 = vector.broadcast %53 : vector<1x32xf32> to vector<8x32xf32>
    %55 = arith.mulf %52, %54 : vector<8x32xf32>
    %c0_30 = arith.constant 0 : index
    %c0_31 = arith.constant 0 : index
    %56 = vector.load %arg11[%c0_30, %c0_31] : memref<1x32xf32, #tpu.memory_space<vmem>>, vector<1x32xf32>
    %57 = vector.broadcast %56 : vector<1x32xf32> to vector<8x32xf32>
    %58 = arith.addf %55, %57 : vector<8x32xf32>
    %cst_32 = arith.constant 0.000000e+00 : f32
    %59 = vector.broadcast %cst_32 : f32 to vector<8x32xf32>
    %60 = arith.maximumf %58, %59 : vector<8x32xf32>
    %61 = arith.subf %50, %60 : vector<8x32xf32>
    %c0_33 = arith.constant 0 : index
    %62 = memref.load %arg15[%c0_33] : memref<1xf32, #tpu.memory_space<smem>>
    %63 = vector.broadcast %62 : f32 to vector<8x32xf32>
    %64 = arith.mulf %61, %63 : vector<8x32xf32>
    %65 = arith.negf %64 : vector<8x32xf32>
    %66 = math.exp %65 : vector<8x32xf32>
    %cst_34 = arith.constant 1.000000e+00 : f32
    %67 = vector.broadcast %cst_34 : f32 to vector<8x32xf32>
    %68 = arith.addf %67, %66 : vector<8x32xf32>
    %69 = arith.divf %67, %68 : vector<8x32xf32>
    %c0_35 = arith.constant 0 : index
    %c0_36 = arith.constant 0 : index
    %70 = vector.load %arg12[%c0_35, %c0_36] : memref<32x128xf32, #tpu.memory_space<vmem>>, vector<32x128xf32>
    %cst_37 = arith.constant dense<0.000000e+00> : vector<8x128xf32>
    %71 = tpu.matmul %7, %70, %cst_37 {dimension_numbers = #tpu.dot_dimension_numbers<[1], [0], [0], [1], [0, 0, 1, 1], [], []>} : vector<8x32xf32>, vector<32x128xf32>, vector<8x128xf32> -> vector<8x128xf32>
    %72 = arith.mulf %7, %69 : vector<8x32xf32>
    %c0_38 = arith.constant 0 : index
    %c0_39 = arith.constant 0 : index
    %73 = vector.load %arg13[%c0_38, %c0_39] : memref<32x128xf32, #tpu.memory_space<vmem>>, vector<32x128xf32>
    %cst_40 = arith.constant dense<0.000000e+00> : vector<8x128xf32>
    %74 = tpu.matmul %72, %73, %cst_40 {dimension_numbers = #tpu.dot_dimension_numbers<[1], [0], [0], [1], [0, 0, 1, 1], [], []>} : vector<8x32xf32>, vector<32x128xf32>, vector<8x128xf32> -> vector<8x128xf32>
    %75 = arith.addf %71, %74 : vector<8x128xf32>
    %c0_41 = arith.constant 0 : index
    %c0_42 = arith.constant 0 : index
    %76 = vector.load %arg14[%c0_41, %c0_42] : memref<1x128xf32, #tpu.memory_space<vmem>>, vector<1x128xf32>
    %77 = vector.broadcast %76 : vector<1x128xf32> to vector<8x128xf32>
    %78 = arith.addf %75, %77 : vector<8x128xf32>
    %c0_43 = arith.constant 0 : index
    %c0_44 = arith.constant 0 : index
    %79 = vector.load %arg16[%c0_43, %c0_44] : memref<8x128xf32, #tpu.memory_space<vmem>>, vector<8x128xf32>
    tpu.vector_store %arg16[%c0_43, %c0_44], %78 {strides = array<i32>} : memref<8x128xf32, #tpu.memory_space<vmem>>, vector<8x128xf32>,
    return
  }
  func.func @transform_0(%arg0: i32) -> (i32, i32) {
    %c0_i32 = arith.constant 0 : i32
    %c0_i32_0 = arith.constant 0 : i32
    return %arg0, %c0_i32 : i32, i32
  }
  func.func @transform_1(%arg0: i32) -> (i32, i32) {
    %c0_i32 = arith.constant 0 : i32
    %c0_i32_0 = arith.constant 0 : i32
    %c0_i32_1 = arith.constant 0 : i32
    return %c0_i32, %c0_i32_0 : i32, i32
  }
  func.func @transform_2(%arg0: i32) -> (i32, i32) {
    %c0_i32 = arith.constant 0 : i32
    %c0_i32_0 = arith.constant 0 : i32
    %c0_i32_1 = arith.constant 0 : i32
    return %c0_i32, %c0_i32_0 : i32, i32
  }
  func.func @transform_3(%arg0: i32) -> (i32, i32) {
    %c0_i32 = arith.constant 0 : i32
    %c0_i32_0 = arith.constant 0 : i32
    %c0_i32_1 = arith.constant 0 : i32
    return %c0_i32, %c0_i32_0 : i32, i32
  }
  func.func @transform_4(%arg0: i32) -> (i32, i32) {
    %c0_i32 = arith.constant 0 : i32
    %c0_i32_0 = arith.constant 0 : i32
    %c0_i32_1 = arith.constant 0 : i32
    return %c0_i32, %c0_i32_0 : i32, i32
  }
  func.func @transform_5(%arg0: i32) -> (i32, i32) {
    %c0_i32 = arith.constant 0 : i32
    %c0_i32_0 = arith.constant 0 : i32
    %c0_i32_1 = arith.constant 0 : i32
    return %c0_i32, %c0_i32_0 : i32, i32
  }
  func.func @transform_6(%arg0: i32) -> (i32, i32) {
    %c0_i32 = arith.constant 0 : i32
    %c0_i32_0 = arith.constant 0 : i32
    %c0_i32_1 = arith.constant 0 : i32
    return %c0_i32, %c0_i32_0 : i32, i32
  }
  func.func @transform_7(%arg0: i32) -> (i32, i32) {
    %c0_i32 = arith.constant 0 : i32
    %c0_i32_0 = arith.constant 0 : i32
    %c0_i32_1 = arith.constant 0 : i32
    return %c0_i32, %c0_i32_0 : i32, i32
  }
  func.func @transform_8(%arg0: i32) -> (i32, i32) {
    %c0_i32 = arith.constant 0 : i32
    %c0_i32_0 = arith.constant 0 : i32
    %c0_i32_1 = arith.constant 0 : i32
    return %c0_i32, %c0_i32_0 : i32, i32
  }
  func.func @transform_9(%arg0: i32) -> (i32, i32) {
    %c0_i32 = arith.constant 0 : i32
    %c0_i32_0 = arith.constant 0 : i32
    %c0_i32_1 = arith.constant 0 : i32
    return %c0_i32, %c0_i32_0 : i32, i32
  }
  func.func @transform_10(%arg0: i32) -> (i32, i32) {
    %c0_i32 = arith.constant 0 : i32
    %c0_i32_0 = arith.constant 0 : i32
    %c0_i32_1 = arith.constant 0 : i32
    return %c0_i32, %c0_i32_0 : i32, i32
  }
  func.func @transform_11(%arg0: i32) -> (i32, i32) {
    %c0_i32 = arith.constant 0 : i32
    %c0_i32_0 = arith.constant 0 : i32
    %c0_i32_1 = arith.constant 0 : i32
    return %c0_i32, %c0_i32_0 : i32, i32
  }
  func.func @transform_12(%arg0: i32) -> (i32, i32) {
    %c0_i32 = arith.constant 0 : i32
    %c0_i32_0 = arith.constant 0 : i32
    %c0_i32_1 = arith.constant 0 : i32
    return %c0_i32, %c0_i32_0 : i32, i32
  }
  func.func @transform_13(%arg0: i32) -> (i32, i32) {
    %c0_i32 = arith.constant 0 : i32
    %c0_i32_0 = arith.constant 0 : i32
    %c0_i32_1 = arith.constant 0 : i32
    return %c0_i32, %c0_i32_0 : i32, i32
  }
  func.func @transform_14(%arg0: i32) -> i32 {
    %c0_i32 = arith.constant 0 : i32
    %c0_i32_0 = arith.constant 0 : i32
    return %c0_i32 : i32
  }
  func.func @transform_15(%arg0: i32) -> (i32, i32) {
    %c0_i32 = arith.constant 0 : i32
    %c0_i32_0 = arith.constant 0 : i32
    return %arg0, %c0_i32 : i32, i32
  }
}

</mosaic_0001>

<bundles_post_ra>
// kernel: tpu_custom_call.1
= control target key start
LH: loop header
LB: loop body
LE: loop exit
PB: predicated region body
PF: predicated region fallthrough
CT: control target
= control target key end

     0   :  { %s1741_s0 = inlined_call_operand.vmem [shape: f32[8,1024], index: 0, kind: input, shape index: {}]   ;;  %s1742_s1 = inlined_call_operand.vmem [shape: f32[1024,32], index: 1, kind: input, shape index: {}]   ;;  %s1743_s2 = inlined_call_operand.vmem [shape: f32[1,32], index: 2, kind: input, shape index: {}]   ;;  %s1744_s3 = inlined_call_operand.vmem [shape: f32[32,32], index: 3, kind: input, shape index: {}]   ;;  %s1745_s4 = inlined_call_operand.vmem [shape: f32[1,32], index: 4, kind: input, shape index: {}]   ;;  %s1746_s5 = inlined_call_operand.vmem [shape: f32[1,32], index: 5, kind: input, shape index: {}]   ;;  %s1747_s6 = inlined_call_operand.vmem [shape: f32[1,32], index: 6, kind: input, shape index: {}]   ;;  %s1748_s7 = inlined_call_operand.vmem [shape: f32[32,32], index: 7, kind: input, shape index: {}]   ;;  %s1749_s8 = inlined_call_operand.vmem [shape: f32[1,32], index: 8, kind: input, shape index: {}]   ;;  %s1750_s9 = inlined_call_operand.vmem [shape: f32[1,32], index: 9, kind: input, shape index: {}]   ;;  %s1751_s10 = inlined_call_operand.vmem [shape: f32[1,32], index: 10, kind: input, shape index: {}]   ;;  %s1752_s11 = inlined_call_operand.vmem [shape: f32[32,128], index: 11, kind: input, shape index: {}]   ;;  %s1753_s12 = inlined_call_operand.vmem [shape: f32[32,128], index: 12, kind: input, shape index: {}]   ;;  %s1754_s13 = inlined_call_operand.vmem [shape: f32[1,128], index: 13, kind: input, shape index: {}]   ;;  %s1755_s14 = inlined_call_operand.<no memory space> [shape: f32[1], index: 14, kind: input, shape index: {}]   ;;  %s1756_s15 = inlined_call_operand.hbm [shape: f32[8,128], index: 15, kind: output, shape index: {}]  }
   0x1   :  { %v91_v0 = vld [vmem:[%s1742_s1 + $0xf8] sm:$0xff]  ;;  %v90_v4 = vld [vmem:[%s1742_s1 + $0xf0] sm:$0xff]  ;;  %v89_v8 = vld [vmem:[%s1742_s1 + $0xe8] sm:$0xff] }
   0x2   :  { %v123_v1 = vld [vmem:[%s1742_s1 + $0x1f8] sm:$0xff]  ;;  %899 = vmatprep.subr.mxu0 %v91_v0  ;;  %v122_v5 = vld [vmem:[%s1742_s1 + $0x1f0] sm:$0xff]  ;;  %v121_v9 = vld [vmem:[%s1742_s1 + $0x1e8] sm:$0xff] }
   0x3   :  { %v75_v2 = vld [vmem:[%s1742_s1 + $0x78] sm:$0xff]  ;;  %934 = vmatprep.subr.mxu1 %v123_v1  ;;  %v74_v6 = vld [vmem:[%s1742_s1 + $0x70] sm:$0xff]  ;;  %v73_v10 = vld [vmem:[%s1742_s1 + $0x68] sm:$0xff] }
   0x4   :  { %v107_v3 = vld [vmem:[%s1742_s1 + $0x178] sm:$0xff]  ;;  %900 = vmatpush3.msra.mxu0 %v75_v2  ;;  %v106_v7 = vld [vmem:[%s1742_s1 + $0x170] sm:$0xff]  ;;  %v105_v11 = vld [vmem:[%s1742_s1 + $0x168] sm:$0xff] }
   0x5   :  { %935 = vmatpush3.msra.mxu1 %v107_v3  ;;  %901 = vmatprep.subr.mxu0 %v90_v4  ;;  %v88_v12 = vld [vmem:[%s1742_s1 + $0xe0] sm:$0xff]  ;;  %v87_v16 = vld [vmem:[%s1742_s1 + $0xd8] sm:$0xff]  ;;  %v86_v20 = vld [vmem:[%s1742_s1 + $0xd0] sm:$0xff] }
   0x6   :  { %936 = vmatprep.subr.mxu1 %v122_v5  ;;  %902 = vmatpush3.msra.mxu0 %v74_v6  ;;  %v120_v13 = vld [vmem:[%s1742_s1 + $0x1e0] sm:$0xff]  ;;  %v119_v17 = vld [vmem:[%s1742_s1 + $0x1d8] sm:$0xff]  ;;  %v118_v21 = vld [vmem:[%s1742_s1 + $0x1d0] sm:$0xff] }
   0x7   :  { %937 = vmatpush3.msra.mxu1 %v106_v7  ;;  %903 = vmatprep.subr.mxu0 %v89_v8  ;;  %v72_v14 = vld [vmem:[%s1742_s1 + $0x60] sm:$0xff]  ;;  %v71_v18 = vld [vmem:[%s1742_s1 + $0x58] sm:$0xff]  ;;  %v70_v22 = vld [vmem:[%s1742_s1 + $0x50] sm:$0xff] }
   0x8   :  { %938 = vmatprep.subr.mxu1 %v121_v9  ;;  %v104_v15 = vld [vmem:[%s1742_s1 + $0x160] sm:$0xff]  ;;  %904 = vmatpush3.msra.mxu0 %v73_v10  ;;  %v103_v19 = vld [vmem:[%s1742_s1 + $0x158] sm:$0xff]  ;;  %v102_v23 = vld [vmem:[%s1742_s1 + $0x150] sm:$0xff] }
   0x9   :  { %939 = vmatpush3.msra.mxu1 %v105_v11  ;;  %905 = vmatprep.subr.mxu0 %v88_v12  ;;  %v85_v24 = vld [vmem:[%s1742_s1 + $0xc8] sm:$0xff]  ;;  %v84_v28 = vld [vmem:[%s1742_s1 + $0xc0] sm:$0xff]  ;;  %v83_v32 = vld [vmem:[%s1742_s1 + $0xb8] sm:$0xff] }
   0xa   :  { %940 = vmatprep.subr.mxu1 %v120_v13  ;;  %906 = vmatpush3.msra.mxu0 %v72_v14  ;;  %v117_v25 = vld [vmem:[%s1742_s1 + $0x1c8] sm:$0xff]  ;;  %v116_v29 = vld [vmem:[%s1742_s1 + $0x1c0] sm:$0xff]  ;;  %v115_v33 = vld [vmem:[%s1742_s1 + $0x1b8] sm:$0xff] }
   0xb   :  { %941 = vmatpush3.msra.mxu1 %v104_v15  ;;  %907 = vmatprep.subr.mxu0 %v87_v16  ;;  %v69_v26 = vld [vmem:[%s1742_s1 + $0x48] sm:$0xff]  ;;  %v68_v30 = vld [vmem:[%s1742_s1 + $0x40] sm:$0xff]  ;;  %v67_v34 = vld [vmem:[%s1742_s1 + $0x38] sm:$0xff] }
   0xc   :  { %942 = vmatprep.subr.mxu1 %v119_v17  ;;  %908 = vmatpush3.msra.mxu0 %v71_v18  ;;  %v101_v27 = vld [vmem:[%s1742_s1 + $0x148] sm:$0xff]  ;;  %v100_v31 = vld [vmem:[%s1742_s1 + $0x140] sm:$0xff]  ;;  %v99_v35 = vld [vmem:[%s1742_s1 + $0x138] sm:$0xff] }
   0xd   :  { %943 = vmatpush3.msra.mxu1 %v103_v19  ;;  %909 = vmatprep.subr.mxu0 %v86_v20  ;;  %v82_v36 = vld [vmem:[%s1742_s1 + $0xb0] sm:$0xff]  ;;  %v81_v40 = vld [vmem:[%s1742_s1 + $0xa8] sm:$0xff]  ;;  %v80_v44 = vld [vmem:[%s1742_s1 + $0xa0] sm:$0xff] }
   0xe   :  { %944 = vmatprep.subr.mxu1 %v118_v21  ;;  %910 = vmatpush3.msra.mxu0 %v70_v22  ;;  %v114_v37 = vld [vmem:[%s1742_s1 + $0x1b0] sm:$0xff]  ;;  %v113_v41 = vld [vmem:[%s1742_s1 + $0x1a8] sm:$0xff]  ;;  %v112_v45 = vld [vmem:[%s1742_s1 + $0x1a0] sm:$0xff] }
   0xf   :  { %945 = vmatpush3.msra.mxu1 %v102_v23  ;;  %911 = vmatprep.subr.mxu0 %v85_v24  ;;  %v66_v38 = vld [vmem:[%s1742_s1 + $0x30] sm:$0xff]  ;;  %v65_v42 = vld [vmem:[%s1742_s1 + $0x28] sm:$0xff]  ;;  %v64_v46 = vld [vmem:[%s1742_s1 + $0x20] sm:$0xff] }
  0x10   :  { %946 = vmatprep.subr.mxu1 %v117_v25  ;;  %912 = vmatpush3.msra.mxu0 %v69_v26  ;;  %v98_v39 = vld [vmem:[%s1742_s1 + $0x130] sm:$0xff]  ;;  %v97_v43 = vld [vmem:[%s1742_s1 + $0x128] sm:$0xff]  ;;  %v96_v47 = vld [vmem:[%s1742_s1 + $0x120] sm:$0xff] }
  0x11   :  { %947 = vmatpush3.msra.mxu1 %v101_v27  ;;  %913 = vmatprep.subr.mxu0 %v84_v28  ;;  %v79_v48 = vld [vmem:[%s1742_s1 + $0x98] sm:$0xff]  ;;  %v78_v52 = vld [vmem:[%s1742_s1 + $0x90] sm:$0xff]  ;;  %v77_v56 = vld [vmem:[%s1742_s1 + $0x88] sm:$0xff] }
  0x12   :  { %948 = vmatprep.subr.mxu1 %v116_v29  ;;  %914 = vmatpush3.msra.mxu0 %v68_v30  ;;  %v111_v49 = vld [vmem:[%s1742_s1 + $0x198] sm:$0xff]  ;;  %v110_v53 = vld [vmem:[%s1742_s1 + $0x190] sm:$0xff]  ;;  %v109_v57 = vld [vmem:[%s1742_s1 + $0x188] sm:$0xff] }
  0x13   :  { %949 = vmatpush3.msra.mxu1 %v100_v31  ;;  %915 = vmatprep.subr.mxu0 %v83_v32  ;;  %v63_v50 = vld [vmem:[%s1742_s1 + $0x18] sm:$0xff]  ;;  %v62_v54 = vld [vmem:[%s1742_s1 + $0x10] sm:$0xff]  ;;  %v61_v58 = vld [vmem:[%s1742_s1 + $0x8] sm:$0xff] }
  0x14   :  { %950 = vmatprep.subr.mxu1 %v115_v33  ;;  %916 = vmatpush3.msra.mxu0 %v67_v34  ;;  %v95_v51 = vld [vmem:[%s1742_s1 + $0x118] sm:$0xff]  ;;  %v94_v55 = vld [vmem:[%s1742_s1 + $0x110] sm:$0xff]  ;;  %v93_v59 = vld [vmem:[%s1742_s1 + $0x108] sm:$0xff] }
  0x15   :  { %951 = vmatpush3.msra.mxu1 %v99_v35  ;;  %917 = vmatprep.subr.mxu0 %v82_v36  ;;  %v76_v60 = vld [vmem:[%s1742_s1 + $0x80] sm:$0xff]  ;;  %v53_v63 = vld [vmem:[%s1741_s0 + $0x8] sm:$0xff]  ;;  %v55_v2 = vld [vmem:[%s1741_s0 + $0x18] sm:$0xff] }
  0x16   :  { %952 = vmatprep.subr.mxu1 %v114_v37  ;;  %918 = vmatpush3.msra.mxu0 %v66_v38  ;;  %v108_v61 = vld [vmem:[%s1742_s1 + $0x180] sm:$0xff]  ;;  %v155_v3 = vld [vmem:[%s1742_s1 + $0x2f8] sm:$0xff]  ;;  %v54_v5 = vld [vmem:[%s1741_s0 + $0x10] sm:$0xff] }
  0x17   :  { %953 = vmatpush3.msra.mxu1 %v98_v39  ;;  %919 = vmatprep.subr.mxu0 %v81_v40  ;;  %v60_v62 = vld [vmem:[%s1742_s1] sm:$0xff]  ;;  %v187_v4 = vld [vmem:[%s1742_s1 + $0x3f8] sm:$0xff]  ;;  %v154_v8 = vld [vmem:[%s1742_s1 + $0x2f0] sm:$0xff] }
  0x18   :  { %954 = vmatprep.subr.mxu1 %v113_v41  ;;  %920 = vmatpush3.msra.mxu0 %v65_v42  ;;  %v92_v0 = vld [vmem:[%s1742_s1 + $0x100] sm:$0xff]  ;;  %v139_v6 = vld [vmem:[%s1742_s1 + $0x278] sm:$0xff]  ;;  %v186_v9 = vld [vmem:[%s1742_s1 + $0x3f0] sm:$0xff] }
  0x19   :  { %955 = vmatpush3.msra.mxu1 %v97_v43  ;;  %921 = vmatprep.subr.mxu0 %v80_v44  ;;  %v52_v1 = vld [vmem:[%s1741_s0] sm:$0xff]  ;;  %v171_v7 = vld [vmem:[%s1742_s1 + $0x378] sm:$0xff]  ;;  %v138_v10 = vld [vmem:[%s1742_s1 + $0x270] sm:$0xff] }
  0x1a   :  { %956 = vmatprep.subr.mxu1 %v112_v45  ;;  %922 = vmatpush3.msra.mxu0 %v64_v46  ;;  %v170_v11 = vld [vmem:[%s1742_s1 + $0x370] sm:$0xff]  ;;  %v153_v12 = vld [vmem:[%s1742_s1 + $0x2e8] sm:$0xff]  ;;  %v152_v16 = vld [vmem:[%s1742_s1 + $0x2e0] sm:$0xff] }
  0x1b   :  { %957 = vmatpush3.msra.mxu1 %v96_v47  ;;  %923 = vmatprep.subr.mxu0 %v79_v48  ;;  %v185_v13 = vld [vmem:[%s1742_s1 + $0x3e8] sm:$0xff]  ;;  %v184_v17 = vld [vmem:[%s1742_s1 + $0x3e0] sm:$0xff]  ;;  %v151_v20 = vld [vmem:[%s1742_s1 + $0x2d8] sm:$0xff] }
  0x1c   :  { %958 = vmatprep.subr.mxu1 %v111_v49  ;;  %924 = vmatpush3.msra.mxu0 %v63_v50  ;;  %v137_v14 = vld [vmem:[%s1742_s1 + $0x268] sm:$0xff]  ;;  %v136_v18 = vld [vmem:[%s1742_s1 + $0x260] sm:$0xff]  ;;  %v183_v21 = vld [vmem:[%s1742_s1 + $0x3d8] sm:$0xff] }
  0x1d   :  { %959 = vmatpush3.msra.mxu1 %v95_v51  ;;  %925 = vmatprep.subr.mxu0 %v78_v52  ;;  %v169_v15 = vld [vmem:[%s1742_s1 + $0x368] sm:$0xff]  ;;  %v168_v19 = vld [vmem:[%s1742_s1 + $0x360] sm:$0xff]  ;;  %v135_v22 = vld [vmem:[%s1742_s1 + $0x258] sm:$0xff] }
  0x1e   :  { %960 = vmatprep.subr.mxu1 %v110_v53  ;;  %926 = vmatpush3.msra.mxu0 %v62_v54  ;;  %v167_v23 = vld [vmem:[%s1742_s1 + $0x358] sm:$0xff]  ;;  %v150_v24 = vld [vmem:[%s1742_s1 + $0x2d0] sm:$0xff]  ;;  %v149_v28 = vld [vmem:[%s1742_s1 + $0x2c8] sm:$0xff] }
  0x1f   :  { %961 = vmatpush3.msra.mxu1 %v94_v55  ;;  %927 = vmatprep.subr.mxu0 %v77_v56  ;;  %v182_v25 = vld [vmem:[%s1742_s1 + $0x3d0] sm:$0xff]  ;;  %v181_v29 = vld [vmem:[%s1742_s1 + $0x3c8] sm:$0xff] }
  0x20   :  { %962 = vmatprep.subr.mxu1 %v109_v57  ;;  %928 = vmatpush3.msra.mxu0 %v61_v58  ;;  %v134_v26 = vld [vmem:[%s1742_s1 + $0x250] sm:$0xff]  ;;  %v133_v30 = vld [vmem:[%s1742_s1 + $0x248] sm:$0xff] }
  0x21   :  { %963 = vmatpush3.msra.mxu1 %v93_v59  ;;  %929 = vmatprep.subr.mxu0 %v76_v60  ;;  %v166_v27 = vld [vmem:[%s1742_s1 + $0x350] sm:$0xff]  ;;  %v165_v31 = vld [vmem:[%s1742_s1 + $0x348] sm:$0xff] }
  0x22   :  { %964 = vmatprep.subr.mxu1 %v108_v61  ;;  %930 = vmatpush3.msra.mxu0 %v60_v62 }
  0x23   :  { %259 = vmatprep.mubr.f32.mxu0 %v53_v63  ;;  %965 = vmatpush3.msra.mxu1 %v92_v0 }
  0x24   :  { %260 = vmatmul.mubr.f32.vlgmr.msra.gmra.mxu0 %v52_v1  ;;  %329 = vmatprep.mubr.f32.mxu1 %v55_v2 }
  0x25   :  { %969 = vmatprep.subr.mxu0 %v155_v3  ;;  %1004 = vmatprep.subr.mxu1 %v187_v4 }
  0x26   :  { %330 = vmatmul.mubr.f32.vlgmr.msra.gmra.mxu1 %v54_v5  ;;  %970 = vmatpush3.msra.mxu0 %v139_v6 }
  0x27   :  { %1005 = vmatpush3.msra.mxu1 %v171_v7  ;;  %971 = vmatprep.subr.mxu0 %v154_v8 }
  0x28   :  { %1006 = vmatprep.subr.mxu1 %v186_v9  ;;  %972 = vmatpush3.msra.mxu0 %v138_v10 }
  0x29   :  { %1007 = vmatpush3.msra.mxu1 %v170_v11  ;;  %973 = vmatprep.subr.mxu0 %v153_v12 }
  0x2a   :  { %1008 = vmatprep.subr.mxu1 %v185_v13  ;;  %974 = vmatpush3.msra.mxu0 %v137_v14 }
  0x2b   :  { %1009 = vmatpush3.msra.mxu1 %v169_v15  ;;  %975 = vmatprep.subr.mxu0 %v152_v16 }
  0x2c   :  { %1010 = vmatprep.subr.mxu1 %v184_v17  ;;  %976 = vmatpush3.msra.mxu0 %v136_v18 }
  0x2d   :  { %1011 = vmatpush3.msra.mxu1 %v168_v19  ;;  %977 = vmatprep.subr.mxu0 %v151_v20 }
  0x2e   :  { %1012 = vmatprep.subr.mxu1 %v183_v21  ;;  %978 = vmatpush3.msra.mxu0 %v135_v22 }
  0x2f   :  { %1013 = vmatpush3.msra.mxu1 %v167_v23  ;;  %979 = vmatprep.subr.mxu0 %v150_v24 }
  0x30   :  { %1014 = vmatprep.subr.mxu1 %v182_v25 }
  0x31   :  { %21 = vsyncpa [#allocation4], 0  ;;  %980 = vmatpush3.msra.mxu0 %v134_v26  ;;  %1015 = vmatpush3.msra.mxu1 %v166_v27  ;;  %v148_v32 = vld [vmem:[%s1742_s1 + $0x2c0] sm:$0xff]  ;;  %v147_v36 = vld [vmem:[%s1742_s1 + $0x2b8] sm:$0xff]  ;;  %v1134_v8 = vmov 0.0   ;;  %vm1135_vm0 = vmmov 0  }
  0x32   :  { %v180_v33 = vld [vmem:[%s1742_s1 + $0x3c0] sm:$0xff]  ;;  %981 = vmatprep.subr.mxu0 %v149_v28  ;;  %1016 = vmatprep.subr.mxu1 %v181_v29  ;;  %v179_v37 = vld [vmem:[%s1742_s1 + $0x3b8] sm:$0xff]  ;;  %v146_v40 = vld [vmem:[%s1742_s1 + $0x2b0] sm:$0xff]  ;;  %vm487_vm1 = vcmask 261120  }
  0x33   :  { %v132_v34 = vld [vmem:[%s1742_s1 + $0x240] sm:$0xff]  ;;  %982 = vmatpush3.msra.mxu0 %v133_v30  ;;  %1017 = vmatpush3.msra.mxu1 %v165_v31  ;;  %v131_v38 = vld [vmem:[%s1742_s1 + $0x238] sm:$0xff]  ;;  %v178_v41 = vld [vmem:[%s1742_s1 + $0x3b0] sm:$0xff] }
  0x34   :  { %v164_v35 = vld [vmem:[%s1742_s1 + $0x340] sm:$0xff]  ;;  %983 = vmatprep.subr.mxu0 %v148_v32  ;;  %1018 = vmatprep.subr.mxu1 %v180_v33  ;;  %v163_v39 = vld [vmem:[%s1742_s1 + $0x338] sm:$0xff]  ;;  %v130_v42 = vld [vmem:[%s1742_s1 + $0x230] sm:$0xff] }
  0x35   :  { %984 = vmatpush3.msra.mxu0 %v132_v34  ;;  %1019 = vmatpush3.msra.mxu1 %v164_v35  ;;  %v162_v43 = vld [vmem:[%s1742_s1 + $0x330] sm:$0xff]  ;;  %v145_v44 = vld [vmem:[%s1742_s1 + $0x2a8] sm:$0xff]  ;;  %v144_v48 = vld [vmem:[%s1742_s1 + $0x2a0] sm:$0xff] }
  0x36   :  { %985 = vmatprep.subr.mxu0 %v147_v36  ;;  %1020 = vmatprep.subr.mxu1 %v179_v37  ;;  %v177_v45 = vld [vmem:[%s1742_s1 + $0x3a8] sm:$0xff]  ;;  %v176_v49 = vld [vmem:[%s1742_s1 + $0x3a0] sm:$0xff]  ;;  %v143_v52 = vld [vmem:[%s1742_s1 + $0x298] sm:$0xff] }
  0x37   :  { %986 = vmatpush3.msra.mxu0 %v131_v38  ;;  %1021 = vmatpush3.msra.mxu1 %v163_v39  ;;  %v129_v46 = vld [vmem:[%s1742_s1 + $0x228] sm:$0xff]  ;;  %v128_v50 = vld [vmem:[%s1742_s1 + $0x220] sm:$0xff]  ;;  %v175_v53 = vld [vmem:[%s1742_s1 + $0x398] sm:$0xff] }
  0x38   :  { %987 = vmatprep.subr.mxu0 %v146_v40  ;;  %1022 = vmatprep.subr.mxu1 %v178_v41  ;;  %v161_v47 = vld [vmem:[%s1742_s1 + $0x328] sm:$0xff]  ;;  %v160_v51 = vld [vmem:[%s1742_s1 + $0x320] sm:$0xff]  ;;  %v127_v54 = vld [vmem:[%s1742_s1 + $0x218] sm:$0xff] }
  0x39   :  { %988 = vmatpush3.msra.mxu0 %v130_v42  ;;  %1023 = vmatpush3.msra.mxu1 %v162_v43  ;;  %v159_v55 = vld [vmem:[%s1742_s1 + $0x318] sm:$0xff]  ;;  %v142_v56 = vld [vmem:[%s1742_s1 + $0x290] sm:$0xff]  ;;  %v141_v60 = vld [vmem:[%s1742_s1 + $0x288] sm:$0xff] }
  0x3a   :  { %989 = vmatprep.subr.mxu0 %v145_v44  ;;  %1024 = vmatprep.subr.mxu1 %v177_v45  ;;  %v174_v57 = vld [vmem:[%s1742_s1 + $0x390] sm:$0xff]  ;;  %v173_v61 = vld [vmem:[%s1742_s1 + $0x388] sm:$0xff]  ;;  %v140_v0 = vld [vmem:[%s1742_s1 + $0x280] sm:$0xff] }
  0x3b   :  { %990 = vmatpush3.msra.mxu0 %v129_v46  ;;  %1025 = vmatpush3.msra.mxu1 %v161_v47  ;;  %v126_v58 = vld [vmem:[%s1742_s1 + $0x210] sm:$0xff]  ;;  %v125_v62 = vld [vmem:[%s1742_s1 + $0x208] sm:$0xff]  ;;  %v172_v1 = vld [vmem:[%s1742_s1 + $0x380] sm:$0xff] }
  0x3c   :  { %991 = vmatprep.subr.mxu0 %v144_v48  ;;  %1026 = vmatprep.subr.mxu1 %v176_v49  ;;  %v158_v59 = vld [vmem:[%s1742_s1 + $0x310] sm:$0xff]  ;;  %v157_v63 = vld [vmem:[%s1742_s1 + $0x308] sm:$0xff]  ;;  %v124_v2 = vld [vmem:[%s1742_s1 + $0x200] sm:$0xff] }
  0x3d   :  { %992 = vmatpush3.msra.mxu0 %v128_v50  ;;  %1027 = vmatpush3.msra.mxu1 %v160_v51  ;;  %v57_v3 = vld [vmem:[%s1741_s0 + $0x28] sm:$0xff]  ;;  %v156_v4 = vld [vmem:[%s1742_s1 + $0x300] sm:$0xff]  ;;  %v59_v5 = vld [vmem:[%s1741_s0 + $0x38] sm:$0xff] }
  0x3e   :  { %993 = vmatprep.subr.mxu0 %v143_v52  ;;  %1028 = vmatprep.subr.mxu1 %v175_v53  ;;  %v56_v6 = vld [vmem:[%s1741_s0 + $0x20] sm:$0xff]  ;;  %v58_v7 = vld [vmem:[%s1741_s0 + $0x30] sm:$0xff]  ;;  %v564_v9 = vld [vmem:[%s1748_s7 + $0x18] sm:$0xff] }
  0x3f   :  { %994 = vmatpush3.msra.mxu0 %v127_v54  ;;  %1029 = vmatpush3.msra.mxu1 %v159_v55  ;;  %v479_v10 = vld [vmem:[%s1744_s3 + $0x18] sm:$0xff]  ;;  %v563_v11 = vld [vmem:[%s1748_s7 + $0x10] sm:$0xff]  ;;  %v562_v13 = vld [vmem:[%s1748_s7 + $0x8] sm:$0xff] }
  0x40   :  { %995 = vmatprep.subr.mxu0 %v142_v56  ;;  %1030 = vmatprep.subr.mxu1 %v174_v57  ;;  %v478_v12 = vld [vmem:[%s1744_s3 + $0x10] sm:$0xff]  ;;  %v477_v14 = vld [vmem:[%s1744_s3 + $0x8] sm:$0xff]  ;;  %v561_v15 = vld [vmem:[%s1748_s7] sm:$0xff] }
  0x41   :  { %996 = vmatpush3.msra.mxu0 %v126_v58  ;;  %1031 = vmatpush3.msra.mxu1 %v158_v59  ;;  %v476_v16 = vld [vmem:[%s1744_s3] sm:$0xff]  ;;  %v714_v35 = vld [vmem:[%s1752_s11 + $0x18] sm:$0xff]  ;;  %v713_v36 = vld [vmem:[%s1752_s11 + $0x10] sm:$0xff] }
  0x42   :  { %997 = vmatprep.subr.mxu0 %v141_v60  ;;  %1032 = vmatprep.subr.mxu1 %v173_v61  ;;  %v886_v21 = vld [vmem:[%s1743_s2] ss:$0 sm:$0xff]  ;;  %v712_v37 = vld [vmem:[%s1752_s11 + $0x8] sm:$0xff]  ;;  %v719_v61 = vld [vmem:[%s1753_s12 + $0x18] sm:$0xff] }
  0x43   :  { %998 = vmatpush3.msra.mxu0 %v125_v62  ;;  %1033 = vmatpush3.msra.mxu1 %v157_v63  ;;  %v711_v38 = vld [vmem:[%s1752_s11] sm:$0xff]  ;;  %v718_v62 = vld [vmem:[%s1753_s12 + $0x10] sm:$0xff]  ;;  %v717_v63 = vld [vmem:[%s1753_s12 + $0x8] sm:$0xff] }
  0x44   :  { %999 = vmatprep.subr.mxu0 %v140_v0  ;;  %1034 = vmatprep.subr.mxu1 %v172_v1  ;;  %v887_v39 = vld [vmem:[%s1745_s4] ss:$0 sm:$0xff] }
  0x45   :  { %1000 = vmatpush3.msra.mxu0 %v124_v2  ;;  %399 = vmatprep.mubr.f32.mxu0 %v57_v3  ;;  %v889_v41 = vld [vmem:[%s1749_s8] ss:$0 sm:$0xff] }
  0x46   :  { %1035 = vmatpush3.msra.mxu1 %v156_v4  ;;  %469 = vmatprep.mubr.f32.mxu1 %v59_v5  ;;  %v716_v0 = vld [vmem:[%s1753_s12] sm:$0xff] }
  0x47   :  { %400 = vmatmul.mubr.f32.vlgmr.msra.gmra.mxu0 %v56_v6  ;;  %470 = vmatmul.mubr.f32.vlgmr.msra.gmra.mxu1 %v58_v7  ;;  %v891_v7 = vld [vmem:[%s1746_s5] ss:$0 sm:$0xff] }
  0x48   :  { %1070 = vmatprep.subr.mxu1 %v1134_v8  ;;  %1059 = vmatprep.subr.mxu0 %v1134_v8 }
  0x49   :  { %1071 = vmatpush3.msra.mxu1 %v564_v9  ;;  %1060 = vmatpush3.msra.mxu0 %v479_v10  ;;  %v893_v9 = vld [vmem:[%s1750_s9] ss:$0 sm:$0xff] }
  0x4a   :  { %1072 = vmatprep.subr.mxu1 %v1134_v8  ;;  %1061 = vmatprep.subr.mxu0 %v1134_v8 }
  0x4b   :  { %1073 = vmatpush3.msra.mxu1 %v563_v11  ;;  %1062 = vmatpush3.msra.mxu0 %v478_v12  ;;  %v894_v12 = vld [vmem:[%s1751_s10] ss:$0 sm:$0xff]  ;;  %s1136_s10 = smov [#allocation3]  }
  0x4c   :  { %1074 = vmatprep.subr.mxu1 %v1134_v8  ;;  %1063 = vmatprep.subr.mxu0 %v1134_v8  ;;  %s878_s22 = sshll.u32 %s1136_s10, 4  ;;  %s879_s22 = int_to_ptr.vmem [resolvable:$true] %s878_s22 }
  0x4d   :  { %1075 = vmatpush3.msra.mxu1 %v562_v13  ;;  %1064 = vmatpush3.msra.mxu0 %v477_v14  ;;  %p1117_p1 = scmp.lt.s32.totalorder %s879_s22, %s879_s22 }
  0x4e   :  { %1076 = vmatprep.subr.mxu1 %v1134_v8  ;;  %1065 = vmatprep.subr.mxu0 %v1134_v8 }
  0x4f   :  { %1077 = vmatpush3.msra.mxu1 %v561_v15  ;;  %1066 = vmatpush3.msra.mxu0 %v476_v16 }
  0x50   :  { %1067 = vmatprep.mubr.msk.f32.mxu0 %vm1135_vm0, %v1134_v8  ;;  %1078 = vmatprep.mubr.msk.f32.mxu1 %vm1135_vm0, %v1134_v8 }
  0x51   :  { %1092 = vmatprep.subr.mxu1 %v1134_v8  ;;  %1081 = vmatprep.subr.mxu0 %v1134_v8 }
  0xe4   :  { %v931_v17 = vpop.f32.mrf.mxu0 }
  0xe6   :  { %v966_v18 = vpop.f32.mrf.mxu1  ;;  %v932_v19 = vpop.f32.mrf.mxu0 }
  0xe7   :  { %v933_v20 = vadd.f32 %v932_v19, %v931_v17  ;;  %v703_v19 = vstv %s1755_s14  ;;  %s1112_s14 = scalar_lea.vmem %s879_s22, 128 }
  0xe8   :  { %v967_v22 = vpop.f32.mrf.mxu1  ;;  %p1113_p0 = scmp.ne.s32.totalorder %s879_s22, %s1112_s14  ;;  %p1118_p2 = scmp.lt.s32.totalorder %s1112_s14, %s1112_s14 }
  0xe9   :  { %v262_v23 = vadd.f32 %v933_v20, %v886_v21  ;;  %v968_v24 = vadd.f32 %v967_v22, %v966_v18 }
  0xea   :  { %p1119_p3 = por %p1118_p2, %p1117_p1 }
  0xeb   :  { %v332_v29 = vadd.f32 %v968_v24, %v262_v23 }
  0xec   :  { %p1120_p4 = pnand %p1119_p3, %p1113_p0 }
 0x107   :  { %v1001_v25 = vpop.f32.mrf.mxu0  ;;  %v1036_v26 = vpop.f32.mrf.mxu1 }
 0x109   :  { %v1002_v27 = vpop.f32.mrf.mxu0  ;;  %v1037_v28 = vpop.f32.mrf.mxu1 }
 0x10a   :  { %v1003_v30 = vadd.f32 %v1002_v27, %v1001_v25  ;;  %v1038_v32 = vadd.f32 %v1037_v28, %v1036_v26  ;;  %v898_v28 = vld [vmem:[%s1754_s13] ss:$0 sm:$0xff] }
 0x10c   :  { %v402_v31 = vadd.f32 %v1003_v30, %v332_v29 }
 0x10e   :  { %v472_v33 = vadd.f32 %v1038_v32, %v402_v31 }
 0x110   :  { %v1666_v34 = vmax.f32 %v472_v33, 0.0 }
 0x112   :  { %1068 = vmatmul.mubr.msk.f32.vlgmr.msra.gmra.mxu0 %vm487_vm1, %v1666_v34  ;;  %1079 = vmatmul.mubr.msk.f32.vlgmr.msra.gmra.mxu1 %vm487_vm1, %v1666_v34 }
 0x113   :  { %1093 = vmatpush3.msra.mxu1 %v714_v35  ;;  %1100 = vmatprep.mubr.msk.f32.mxu1 %vm1135_vm0, %v1134_v8 }
 0x114   :  { %1094 = vmatprep.subr.mxu1 %v1134_v8  ;;  %1089 = vmatprep.mubr.msk.f32.mxu0 %vm1135_vm0, %v1134_v8 }
 0x115   :  { %1095 = vmatpush3.msra.mxu1 %v713_v36  ;;  %1082 = vmatpush3.msra.mxu0 %v719_v61 }
 0x116   :  { %1096 = vmatprep.subr.mxu1 %v1134_v8  ;;  %1083 = vmatprep.subr.mxu0 %v1134_v8 }
 0x117   :  { %1097 = vmatpush3.msra.mxu1 %v712_v37  ;;  %1084 = vmatpush3.msra.mxu0 %v718_v62 }
 0x118   :  { %1098 = vmatprep.subr.mxu1 %v1134_v8  ;;  %1085 = vmatprep.subr.mxu0 %v1134_v8 }
 0x119   :  { %1099 = vmatpush3.msra.mxu1 %v711_v38  ;;  %1086 = vmatpush3.msra.mxu0 %v717_v63 }
 0x11a   :  { %1101 = vmatmul.mubr.msk.f32.vlgmr.msra.gmra.mxu1 %vm487_vm1, %v1666_v34  ;;  %1087 = vmatprep.subr.mxu0 %v1134_v8  ;;  %v892_v8 = vld [vmem:[%s1747_s6] ss:$0 sm:$0xff] }
 0x11b   :  { %1088 = vmatpush3.msra.mxu0 %v716_v0 }
 0x1d2   :  { %v557_v40 = vpop.f32.mrf.mxu0  ;;  %v638_v42 = vpop.f32.mrf.mxu1 }
 0x1d3   :  { %v558_v43 = vadd.f32 %v887_v39, %v557_v40  ;;  %v639_v46 = vadd.f32 %v889_v41, %v638_v42 }
 0x1d4   :  { %v1069_v44 = vpop.f32.mrf.mxu0  ;;  %v1080_v45 = vpop.f32.mrf.mxu1 }
 0x1d5   :  { %v642_v47 = vsel %vm487_vm1, %v558_v43, 0.0  ;;  %v645_v48 = vsel %vm487_vm1, %v639_v46, 0.0 }
 0x1d6   :  { %643 = vadd.xlane.f32.xlu0 %v642_v47 }
 0x1da   :  { %v859_v49 = vpop.f32.mrf.mxu1  ;;  %646 = vadd.xlane.f32.xlu0 %v645_v48 }
 0x1dc   :  { %v1102_v50 = vpop.f32.mrf.mxu1 }
 0x25f   :  { %v644_v51 = vpop.xlane.xlu0 %643 }
 0x263   :  { %v647_v52 = vpop.xlane.xlu0 %646 }
 0x264   :  { %v648_v53 = vadd.f32 %v647_v52, %v644_v51 }
 0x266   :  { %v650_v54 = vmul.f32 0.015625, %v648_v53 }
 0x268   :  { %v651_v55 = vsub.f32 %v558_v43, %v650_v54  ;;  %v652_v56 = vsub.f32 %v639_v46, %v650_v54 }
 0x26a   :  { %v653_v57 = vmul.f32 %v651_v55, %v651_v55  ;;  %v657_v59 = vmul.f32 %v652_v56, %v652_v56 }
 0x26c   :  { %v654_v58 = vsel %vm487_vm1, %v653_v57, 0.0  ;;  %v658_v60 = vsel %vm487_vm1, %v657_v59, 0.0 }
 0x26d   :  { %655 = vadd.xlane.f32.xlu1 %v654_v58 }
 0x271   :  { %659 = vadd.xlane.f32.xlu1 %v658_v60 }
 0x2f6   :  { %v656_v1 = vpop.xlane.xlu1 %655 }
 0x2fa   :  { %v660_v2 = vpop.xlane.xlu1 %659 }
 0x2fb   :  { %v661_v3 = vadd.f32 %v660_v2, %v656_v1 }
 0x2fd   :  { %v662_v4 = vmul.f32 0.015625, %v661_v3 }
 0x2ff   :  { %v663_v5 = vadd.f32 1e-05, %v662_v4 }
 0x301   :  { %1106 = vrsqrt.f32 %v663_v5 }
 0x30e   :  { %v1107_v6 = vpop.eup %1106 }
 0x30f   :  { %v665_v10 = vmul.f32 %v1107_v6, %v651_v55  ;;  %v683_v11 = vmul.f32 %v1107_v6, %v652_v56 }
 0x311   :  { %v673_v13 = vmul.f32 %v891_v7, %v665_v10  ;;  %v691_v14 = vmul.f32 %v893_v9, %v683_v11 }
 0x313   :  { %v681_v15 = vadd.f32 %v892_v8, %v673_v13  ;;  %v699_v16 = vadd.f32 %v894_v12, %v691_v14 }
 0x315   :  { %v682_v17 = vmax.f32 %v681_v15, 0.0  ;;  %v700_v18 = vmax.f32 %v699_v16, 0.0 }
 0x317   :  { %v701_v20 = vsub.f32 %v682_v17, %v700_v18 }
 0x319   :  { %v704_v21 = vmul.f32 %v703_v19, %v701_v20 }
 0x31b   :  { %v895_v22 = vmul.f32 -1.442695, %v704_v21 }
 0x31d   :  { %1108 = vpow2.f32 %v895_v22 }
 0x32a   :  { %v1109_v23 = vpop.eup %1108 }
 0x32b   :  { %v708_v24 = vadd.f32 1.0, %v1109_v23 }
 0x32d   :  { %1110 = vrcp.f32 %v708_v24 }
 0x33a   :  { %v1111_v25 = vpop.eup %1110 }
 0x33b   :  { %v715_v26 = vmul.f32 %v1111_v25, %v1666_v34 }
 0x33d   :  { %1090 = vmatmul.mubr.msk.f32.vlgmr.msra.gmra.mxu0 %vm487_vm1, %v715_v26 }
 0x3fd   :  { %v789_v27 = vpop.f32.mrf.mxu0 }
 0x3fe   :  { %v860_v29 = vadd.f32 %v859_v49, %v789_v27 }
 0x3ff   :  { %v1091_v30 = vpop.f32.mrf.mxu0 }
 0x400   :  { %v870_v31 = vadd.f32 %v898_v28, %v860_v29 }
 0x402   :  { %871 = vst [vmem:[#allocation3] sm:$0xff] %v870_v31 }
 0x403   :  { %1123 = shalt.err (!%p1120_p4)
}
 0x404   :  { %881 = dma.vmem_to_hbm [thread:$0]  %s879_s22, 128, %s1756_s15, [#allocation4]  }
 0x405   :  { %1132 = dma.done.wait [#allocation4], 128  }
 0x406   :  { %1133 = vsyncadd [#allocation4], 4294967168 }
 0x407   :  { %885 = vsyncpa [#allocation4], 1 }

</bundles_post_ra>
